<compile_context>
chip_gen: v7x
topology: tpu7x:2x2x1
jax: 0.10.0
libtpu: 0.0.40
codegen_flags: <defaults>
</compile_context>

<pallas_src>
import functools

import numpy as np
import jax
import jax.numpy as jnp
from jax.experimental import pallas as pl
from jax.experimental.pallas import tpu as pltpu


def _round_up(x, m):
    return ((x + m - 1) // m) * m


def _cdiv(a, b):
    return (a + b - 1) // b


def _cam_kernel(*refs, pack, matmul_dtype, has_valid):
    if has_valid:
        mu_ref, mask_ref, valid_ref, x_ref, o_ref = refs
    else:
        mu_ref, mask_ref, x_ref, o_ref = refs
        valid_ref = None

    bn, C, H = x_ref.shape
    g = bn // pack
    pc = pack * C

    x_blk = x_ref[...]                                    # (bn, C, H), input dtype
    if has_valid:
        # Ragged last block: zero the garbage trailing batches so Inf/NaN
        # garbage cannot contaminate valid rows through 0*Inf=NaN in e @ x.
        keep = valid_ref[...] > 0.5                       # (bn, C, 1)
        x_blk = jnp.where(keep, x_blk, 0)

    # Group `pack` batches per MXU call: (g, pc, H) with pc = pack*C <= 128.
    xg = x_blk.reshape(g, pc, H)
    xg_mm = xg.astype(matmul_dtype)                       # MXU operands (bf16 by default)

    # Grouped Gram matrix: one (pc,H)@(H,pc) MXU matmul per group.  Cross-batch
    # entries are killed by the precomputed additive block-diagonal mask.
    energy = jnp.einsum("gph,gqh->gpq", xg_mm, xg_mm,
                        preferred_element_type=jnp.float32)        # (g, pc, pc)
    energy = energy + mask_ref[...]                       # + (0 / -1e30), broadcast over g

    # Row-wise softmax (dim=-1) numerator; masked entries exp() to exactly 0,
    # so the attention matrix is exactly block-diagonal (per-batch softmax).
    m = jnp.max(energy, axis=-1, keepdims=True)
    e = jnp.exp(energy - m)                               # (g, pc, pc) f32
    denom = jnp.sum(e, axis=-1, keepdims=True)            # (g, pc, 1)

    # Unnormalised attention @ x; block-diagonal e => stacked per-batch result.
    s = jnp.einsum("gpq,gqh->gph", e.astype(matmul_dtype), xg_mm,
                   preferred_element_type=jnp.float32)    # (g, pc, H)

    # out = para_mu * softmax(energy) @ x + x; the softmax divide is folded
    # into the residual scale via the EUP reciprocal (EUP slot otherwise idle).
    mu = mu_ref[0]                                        # scalar from SMEM
    scale = mu * pl.reciprocal(denom, approx=True)        # (g, pc, 1)
    out = scale * s + xg.astype(jnp.float32)
    o_ref[...] = out.reshape(bn, C, H).astype(o_ref.dtype)


def cam_forward(x, para_mu, *, block_n=None, pack=None,
                matmul_dtype=jnp.bfloat16, vmem_limit_bytes=None):
    """CAM forward pass.  x: (N, C, H); para_mu: shape (1,).  Returns (N, C, H)."""
    N, C, H = x.shape
    para_mu = jnp.asarray(para_mu).reshape((1,)).astype(jnp.float32)

    # Per-generation defaults: v7x has 64 MiB VMEM per TensorCore, v5e/v6e 128 MiB.
    if block_n is None or vmem_limit_bytes is None:
        try:
            info = pltpu.get_tpu_info()
            vmem_cap = int(getattr(info, "vmem_capacity_bytes", 128 * 1024 * 1024))
        except Exception:
            vmem_cap = 64 * 1024 * 1024            # conservative fallback
        if block_n is None:
            block_n = 1024 if vmem_cap >= 100 * 1024 * 1024 else 512
        if vmem_limit_bytes is None:
            vmem_limit_bytes = min(64 * 1024 * 1024, (3 * vmem_cap) // 4)

    # Pack batches so pc = pack*C fills the 128 MXU/vreg lanes; never exceed
    # pc = 128 (exp / mask cost doubles past that for marginal MXU gain).
    if pack is None:
        pack = max(1, 128 // C)
    pack = int(max(1, min(pack, block_n)))
    pc = pack * C

    # Batch rows per grid step: multiple of `pack`.  Aim for >= ~8 grid steps
    # for large N (keeps both v7x TensorCores fed and the pipeline deep) while
    # keeping blocks >= ~512 rows (~2 MiB f32) where possible (measured ~85%
    # of HBM roofline there vs ~63% at 1 MiB blocks).
    bn = min(block_n, _round_up(_cdiv(N, 8), pack))
    bn = max(bn, min(block_n, 512))
    bn = min(bn, _round_up(N, pack))
    bn = _round_up(max(bn, pack), pack)
    num_blocks = _cdiv(N, bn)
    needs_mask = (N % bn) != 0

    # Additive block-diagonal softmax mask (0 on same-batch CxC blocks, -1e30
    # elsewhere); grid-invariant VMEM input (fetched once, stays resident).
    grp = np.arange(pc) // C
    add_mask = jnp.asarray(
        np.where(grp[:, None] == grp[None, :], 0.0, -1e30).astype(np.float32))

    in_specs = [
        pl.BlockSpec(memory_space=pltpu.SMEM),                    # para_mu (scalar)
        pl.BlockSpec((pc, pc), lambda n: (0, 0)),                 # additive mask
    ]
    args = [para_mu, add_mask]
    if needs_mask:
        # Per-batch validity flags, padded to a whole number of blocks so the
        # flag block is always fully in-bounds (tiny: 4*C bytes per batch).
        n_pad = num_blocks * bn
        valid = jnp.broadcast_to(
            (jnp.arange(n_pad) < N)[:, None, None], (n_pad, C, 1)
        ).astype(jnp.float32)
        in_specs.append(pl.BlockSpec((bn, C, 1), lambda n: (n, 0, 0)))
        args.append(valid)
    in_specs.append(pl.BlockSpec((bn, C, H), lambda n: (n, 0, 0)))  # x block
    args.append(x)

    flops = 4 * num_blocks * bn * pc * H            # two (pc x pc x H) matmuls / group
    transcendentals = num_blocks * bn * pc          # softmax exp
    bytes_accessed = 2 * N * C * H * x.dtype.itemsize

    kernel = functools.partial(_cam_kernel, pack=pack,
                               matmul_dtype=matmul_dtype, has_valid=needs_mask)

    return pl.pallas_call(
        kernel,
        out_shape=jax.ShapeDtypeStruct((N, C, H), x.dtype),
        grid_spec=pltpu.PrefetchScalarGridSpec(
            num_scalar_prefetch=0,
            grid=(num_blocks,),
            in_specs=in_specs,
            out_specs=pl.BlockSpec((bn, C, H), lambda n: (n, 0, 0)),
        ),
        compiler_params=pltpu.CompilerParams(
            dimension_semantics=("parallel",),
            vmem_limit_bytes=int(vmem_limit_bytes)),
        cost_estimate=pl.CostEstimate(
            flops=int(flops),
            transcendentals=int(transcendentals),
            bytes_accessed=int(bytes_accessed)),
    )(*args)


def cam_reference(x, para_mu):
    # Pure-JAX reference mirroring the PyTorch forward.
    energy = jnp.einsum("nch,ndh->ncd", x, x)
    attention = jax.nn.softmax(energy, axis=-1)
    out = jnp.einsum("ncd,ndh->nch", attention, x)
    return para_mu[0] * out + x


if __name__ == "__main__":
    key = jax.random.PRNGKey(0)
    # Small shapes; 0.1 scale keeps the softmax un-saturated so the masking /
    # normalisation paths are actually exercised.
    N, C, H = 10, 8, 128
    x = 0.1 * jax.random.normal(key, (N, C, H), dtype=jnp.float32)

    # nn.Parameter(torch.zeros(1)) -> shape (1,).  Nonzero so the attention
    # branch contributes to the output.
    para_mu = jnp.full((1,), 0.5, dtype=jnp.float32)

    ref = cam_reference(x, para_mu)

    # Multi-step grid with a ragged last block (pack=4, in-kernel batch mask).
    out_small = jax.block_until_ready(cam_forward(x, para_mu, block_n=4))
    # Default config: pack=16 -> pc=128, one block covering the whole batch.
    out_default = jax.block_until_ready(cam_forward(x, para_mu))
    # Exact-MXU path (f32 operands) for parity checking.
    out_exact = jax.block_until_ready(
        cam_forward(x, para_mu, matmul_dtype=jnp.float32))

    assert out_small.shape == (N, C, H)
    assert out_default.shape == (N, C, H)
    # bf16 MXU operands + approximate EUP reciprocal: ~1e-3 relative error.
    assert jnp.allclose(out_small, ref, atol=3e-3, rtol=3e-3)
    assert jnp.allclose(out_default, ref, atol=3e-3, rtol=3e-3)
    assert jnp.allclose(out_exact, ref, atol=2e-3, rtol=2e-3)

    print("KERNEL_OK")
</pallas_src>

<mosaic_0001>
module attributes {stable_mosaic.version = 11 : i64} {
  func.func @_cam_kernel(%arg0: i32, %arg1: memref<1xf32, #tpu.memory_space<smem>>, %arg2: memref<32x32xf32, #tpu.memory_space<vmem>>, %arg3: memref<4x8x1xf32, #tpu.memory_space<vmem>>, %arg4: memref<4x8x128xf32, #tpu.memory_space<vmem>>, %arg5: memref<4x8x128xf32, #tpu.memory_space<vmem>>) attributes {dimension_semantics = [#tpu.dimension_semantics<parallel>], iteration_bounds = array<i64: 3>, scalar_prefetch = 0 : i64, scratch_operands = 0 : i64, tpu.core_type = #tpu.core_type<tc>, window_params = [{transform_indices = @transform_0, window_bounds = array<i64: 1>}, {pipeline_mode = #tpu.pipeline_mode<synchronous>, transform_indices = @transform_1, window_bounds = array<i64: 32, 32>}, {transform_indices = @transform_2, window_bounds = array<i64: 4, 8, 1>}, {transform_indices = @transform_3, window_bounds = array<i64: 4, 8, 128>}, {transform_indices = @transform_4, window_bounds = array<i64: 4, 8, 128>}]} {
    %c0 = arith.constant 0 : index
    %c0_0 = arith.constant 0 : index
    %c0_1 = arith.constant 0 : index
    %0 = vector.load %arg4[%c0, %c0_0, %c0_1] : memref<4x8x128xf32, #tpu.memory_space<vmem>>, vector<4x8x128xf32>
    %c0_2 = arith.constant 0 : index
    %c0_3 = arith.constant 0 : index
    %c0_4 = arith.constant 0 : index
    %1 = vector.load %arg3[%c0_2, %c0_3, %c0_4] : memref<4x8x1xf32, #tpu.memory_space<vmem>>, vector<4x8x1xf32>
    %cst = arith.constant 5.000000e-01 : f32
    %2 = vector.broadcast %cst : f32 to vector<4x8x1xf32>
    %3 = arith.cmpf ogt, %1, %2 : vector<4x8x1xf32>
    %c0_i32 = arith.constant 0 : i32
    %4 = arith.sitofp %c0_i32 : i32 to f32
    %5 = vector.shape_cast %3 : vector<4x8x1xi1> to vector<4x8x1xi1>
    %6 = vector.broadcast %5 : vector<4x8x1xi1> to vector<4x8x128xi1>
    %7 = vector.broadcast %4 : f32 to vector<4x8x128xf32>
    %8 = arith.select %6, %0, %7 : vector<4x8x128xi1>, vector<4x8x128xf32>
    %9 = vector.shape_cast %8 : vector<4x8x128xf32> to vector<1x32x128xf32>
    %10 = arith.truncf %9 : vector<1x32x128xf32> to vector<1x32x128xbf16>
    "tpu.trace_start"() <{level = 10 : i32, message = "gph,gqh->gpq"}> : () -> ()
    %cst_5 = arith.constant dense<0.000000e+00> : vector<1x32x32xf32>
    %11 = tpu.matmul %10, %10, %cst_5 {dimension_numbers = #tpu.dot_dimension_numbers<[2], [2], [1], [1], [0, 0, 0, 1, 1, 1], [0], [0]>} : vector<1x32x128xbf16>, vector<1x32x128xbf16>, vector<1x32x32xf32> -> vector<1x32x32xf32>
    "tpu.trace_stop"() : () -> ()
    %c0_6 = arith.constant 0 : index
    %c0_7 = arith.constant 0 : index
    %12 = vector.load %arg2[%c0_6, %c0_7] : memref<32x32xf32, #tpu.memory_space<vmem>>, vector<32x32xf32>
    %13 = vector.shape_cast %12 : vector<32x32xf32> to vector<1x32x32xf32>
    %14 = arith.addf %11, %13 : vector<1x32x32xf32>
    %cst_8 = arith.constant dense<0xFF800000> : vector<1x32xf32>
    %15 = vector.multi_reduction <maximumf>, %14, %cst_8 [2] : vector<1x32x32xf32> to vector<1x32xf32>
    %16 = vector.shape_cast %15 : vector<1x32xf32> to vector<1x32x1xf32>
    %17 = vector.broadcast %16 : vector<1x32x1xf32> to vector<1x32x32xf32>
    %18 = arith.subf %14, %17 : vector<1x32x32xf32>
    %19 = math.exp %18 : vector<1x32x32xf32>
    %cst_9 = arith.constant dense<0.000000e+00> : vector<1x32xf32>
    %20 = vector.multi_reduction <add>, %19, %cst_9 [2] : vector<1x32x32xf32> to vector<1x32xf32>
    %21 = vector.shape_cast %20 : vector<1x32xf32> to vector<1x32x1xf32>
    %22 = arith.truncf %19 : vector<1x32x32xf32> to vector<1x32x32xbf16>
    "tpu.trace_start"() <{level = 10 : i32, message = "gpq,gqh->gph"}> : () -> ()
    %cst_10 = arith.constant dense<0.000000e+00> : vector<1x32x128xf32>
    %23 = tpu.matmul %22, %10, %cst_10 {dimension_numbers = #tpu.dot_dimension_numbers<[2], [1], [1], [2], [0, 0, 0, 1, 1, 2], [0], [0]>} : vector<1x32x32xbf16>, vector<1x32x128xbf16>, vector<1x32x128xf32> -> vector<1x32x128xf32>
    "tpu.trace_stop"() : () -> ()
    %c0_11 = arith.constant 0 : index
    %24 = memref.load %arg1[%c0_11] : memref<1xf32, #tpu.memory_space<smem>>
    %25 = tpu.reciprocal %21 {approx = true} : vector<1x32x1xf32> -> vector<1x32x1xf32>
    %26 = vector.broadcast %24 : f32 to vector<1x32x1xf32>
    %27 = arith.mulf %26, %25 : vector<1x32x1xf32>
    %28 = vector.broadcast %27 : vector<1x32x1xf32> to vector<1x32x128xf32>
    %29 = arith.mulf %28, %23 : vector<1x32x128xf32>
    %30 = arith.addf %29, %9 : vector<1x32x128xf32>
    %31 = vector.shape_cast %30 : vector<1x32x128xf32> to vector<4x8x128xf32>
    %c0_12 = arith.constant 0 : index
    %c0_13 = arith.constant 0 : index
    %c0_14 = arith.constant 0 : index
    %32 = vector.load %arg5[%c0_12, %c0_13, %c0_14] : memref<4x8x128xf32, #tpu.memory_space<vmem>>, vector<4x8x128xf32>
    tpu.vector_store %arg5[%c0_12, %c0_13, %c0_14], %31 {strides = array<i32>} : memref<4x8x128xf32, #tpu.memory_space<vmem>>, vector<4x8x128xf32>,
    return
  }
  func.func @transform_0(%arg0: i32) -> i32 {
    %c0_i32 = arith.constant 0 : i32
    %c0_i32_0 = arith.constant 0 : i32
    return %c0_i32 : i32
  }
  func.func @transform_1(%arg0: i32) -> (i32, i32) {
    %c0_i32 = arith.constant 0 : i32
    %c0_i32_0 = arith.constant 0 : i32
    %c0_i32_1 = arith.constant 0 : i32
    return %c0_i32, %c0_i32_0 : i32, i32
  }
  func.func @transform_2(%arg0: i32) -> (i32, i32, i32) {
    %c0_i32 = arith.constant 0 : i32
    %c0_i32_0 = arith.constant 0 : i32
    %c0_i32_1 = arith.constant 0 : i32
    return %arg0, %c0_i32, %c0_i32_0 : i32, i32, i32
  }
  func.func @transform_3(%arg0: i32) -> (i32, i32, i32) {
    %c0_i32 = arith.constant 0 : i32
    %c0_i32_0 = arith.constant 0 : i32
    %c0_i32_1 = arith.constant 0 : i32
    return %arg0, %c0_i32, %c0_i32_0 : i32, i32, i32
  }
  func.func @transform_4(%arg0: i32) -> (i32, i32, i32) {
    %c0_i32 = arith.constant 0 : i32
    %c0_i32_0 = arith.constant 0 : i32
    %c0_i32_1 = arith.constant 0 : i32
    return %arg0, %c0_i32, %c0_i32_0 : i32, i32, i32
  }
}

</mosaic_0001>

<bundles_post_ra>
// kernel: tpu_custom_call.1
= control target key start
LH: loop header
LB: loop body
LE: loop exit
PB: predicated region body
PF: predicated region fallthrough
CT: control target
= control target key end

     0   :  { %s958_s0 = inlined_call_operand.<no memory space> [shape: f32[1], index: 0, kind: input, shape index: {}]   ;;  %s959_s1 = inlined_call_operand.vmem [shape: f32[32,32], index: 1, kind: input, shape index: {}]   ;;  %s960_s2 = inlined_call_operand.vmem [shape: f32[12,8,1], index: 2, kind: input, shape index: {}]   ;;  %s961_s3 = inlined_call_operand.vmem [shape: f32[10,8,128], index: 3, kind: input, shape index: {}]   ;;  %s962_s4 = inlined_call_operand.hbm [shape: f32[10,8,128], index: 4, kind: output, shape index: {}]  }
   0x1   :  { %9 = sst [smem:[#allocation2]] %s958_s0 }
   0x2   :  { %10 = vsyncpa [#allocation4], 0 }
   0x3   :  { %12 = vsyncpa [#allocation4 + $0x1], 0  ;;  %s766_s17 = smov 0   ;;  %s768_s18 = smov 0  }
   0x4   :  { %s770_s19 = smov 0   ;;  %s772_s20 = smov 0  }
   0x5 LB: > { %s787_s0 = sadd.s32 4294967295, %s732_s20   ;;  %s548_s21 = sadd.s32 4294967294, %s732_s20   ;;  %s732_s20 = sphi %s772_s20, %s968_s20   ;;  %s728_s19 = sphi %s770_s19, %s967_s19   ;;  %s724_s18 = sphi %s768_s18, %s966_s18   ;;  %s720_s17 = sphi %s766_s17, %s965_s17  }
   0x6   : > { %s791_s22 = sadd.s32 1, %s732_s20   ;;  %s119_s23 = sadd.s32 1, %s728_s19 }
   0x7   : > { %s116_s24 = ssub.s32 %s732_s20, %s791_s22  ;;  %p129_p0 = scmp.ne.s32.totalorder %s728_s19, %s724_s18 }
   0x8   : > { %p117_p1 = scmp.eq.s32.totalorder %s116_s24, 0  ;;  %p130_p2 = scmp.eq.s32.totalorder %s787_s0, 2 }
   0x9   : > { %p135_p3 = scmp.ne.s32.totalorder %s724_s18, %s720_s17  ;;  %p136_p4 = scmp.eq.s32.totalorder %s548_s21, 2 }
   0xa   : > { %s802_s25 = scalar_select %p117_p1, %s728_s19, %s119_s23  }
   0xb   : > { %p804_p5 = por %p130_p2, %p129_p0  ;;  %p808_p6 = por %p136_p4, %p135_p3 }
   0xc   : > { %p551_p7 = scmp.ge.s32.totalorder %s732_s20, 1  ;;  %p186_p8 = scmp.lt.s32.totalorder %s732_s20, 4 }
   0xe   : > { %p187_p9 = pnand %p551_p7, %p186_p8 }
   0xf   : > { %s815_s28 = sshll.u32 (!%p187_p9), %s787_s0, 2  ;;  %v734_v0 = vmov (!%p187_p9), 0   ;;  %v285_v19 = vld [vmem:[%s959_s1] sm:$0xff] (!%p187_p9)  ;;  %v287_v21 = vld [vmem:[%s959_s1 + $0x10] sm:$0xff] (!%p187_p9)  ;;  %v286_v23 = vld [vmem:[%s959_s1 + $0x8] sm:$0xff] (!%p187_p9)  ;;  %vm338_vm10 = vcmask (!%p187_p9), 261120  }
  0x10   : > { %190 = sbr.rel (%p187_p9) target bundleno = 811 (0x32b), region = 36  ;;  %652 = vset.pattern.permute.xlu0 (!%p187_p9), %v734_v0  ;;  %p222_p10 = scmp.lt.s32.totalorder (!%p187_p9), %s815_s28, 11  ;;  %653 = vset.pattern.permute.xlu1 (!%p187_p9), %v734_v0  ;;  %v288_v30 = vld [vmem:[%s959_s1 + $0x18] sm:$0xff] (!%p187_p9) }
  0x11   : > { %p232_p11 = scmp.lt.s32.totalorder (!%p187_p9), %s815_s28, 9  ;;  %s432_s5 = sld [smem:[#allocation2]] (!%p187_p9) }
  0x17   : > { %s223_s29 = scalar_select %p222_p10, %s815_s28, 11  ;;  %v437_v63 = vstv %s432_s5 }
  0x18   : > { %s233_s8 = scalar_select %p232_p11, %s815_s28, 9 }
  0x19   : > { %s554_s30 = sshll.u32 %s223_s29, 3 }
  0x1a   : > { %s225_s7 = scalar_lea.vmem %s960_s2, %s554_s30  ;;  %s556_s9 = sshll.u32 %s233_s8, 3 }
  0x1b   : > { %v251_v1 = vld [vmem:[%s225_s7] sm:$0xff]  ;;  %v253_v2 = vld [vmem:[%s225_s7 + $0x10] sm:$0xff]  ;;  %v252_v3 = vld [vmem:[%s225_s7 + $0x8] sm:$0xff]  ;;  %s235_s12 = scalar_lea.vmem %s961_s3, %s556_s9  ;;  %s218_s30 = sand.u32 1, %s724_s18  }
  0x1c   : > { %vm255_vm0 = vcmp.gt.f32.partialorder %v251_v1, 0.5  ;;  %vm257_vm1 = vcmp.gt.f32.partialorder %v253_v2, 0.5  ;;  %vm256_vm2 = vcmp.gt.f32.partialorder %v252_v3, 0.5  ;;  %v254_v4 = vld [vmem:[%s225_s7 + $0x18] sm:$0xff]  ;;  %v831_v11 = vld [vmem:[%s235_s12 + $0x8] sm:$0xff]  ;;  %v833_v12 = vld [vmem:[%s235_s12] sm:$0xff] }
  0x1d   : > { %v259_v5 = vsel %vm255_vm0, 1, %v734_v0  ;;  %v261_v6 = vsel %vm257_vm1, 1, %v734_v0  ;;  %vm258_vm3 = vcmp.gt.f32.partialorder %v254_v4, 0.5  ;;  %v260_v7 = vsel %vm256_vm2, 1, %v734_v0  ;;  %v835_v13 = vld [vmem:[%s235_s12 + $0x10] sm:$0xff]  ;;  %v837_v14 = vld [vmem:[%s235_s12 + $0x18] sm:$0xff] }
  0x1e   : > { %264 = vperm.xlu0 %652, %v259_v5   ;;  %270 = vperm.xlu1 %653, %v261_v6   ;;  %v262_v8 = vsel %vm258_vm3, 1, %v734_v0  ;;  %v558_v15 = vpack.c.bf16 %v831_v11, %v833_v12  ;;  %v561_v18 = vpack.c.bf16 %v837_v14, %v835_v13  ;;  %s552_s6 = sshll.u32 %s218_s30, 5  ;;  %s898_s8 = scalar_lea.sflag [#allocation4], %s218_s30 }
  0x1f   : > { %s220_s7 = scalar_lea.vmem [#allocation3], %s552_s6  ;;  %s463_s9 = ssub.s32 (%p804_p5), 10, %s815_s28 }
  0x20   : > { %p464_p12 = scmp.lt.s32.totalorder (%p804_p5), %s463_s9, 4 }
  0x22   : > { %267 = vperm.xlu0 %652, %v260_v7   ;;  %273 = vperm.xlu1 %653, %v262_v8  }
  0x9d   : > { %v827_v9 = vpop.permute.xlu0 %264  ;;  %v829_v10 = vpop.permute.xlu1 %270 }
  0x9e   : > { %vm277_vm4 = vcmp.eq.s32.totalorder %v829_v10, 1  ;;  %vm275_vm5 = vcmp.eq.s32.totalorder %v827_v9, 1 }
  0x9f   : > { %v281_v8 = vsel %vm277_vm4, %v835_v13, 0.0 }
  0xa1   : > { %v842_v16 = vpop.permute.xlu0 %267  ;;  %v844_v17 = vpop.permute.xlu1 %273 }
  0xa2   : > { %vm276_vm6 = vcmp.eq.s32.totalorder %v842_v16, 1  ;;  %vm278_vm7 = vcmp.eq.s32.totalorder %v844_v17, 1 }
  0xa3   : > { %vm557_vm8 = vmpackc.low %vm276_vm6, %vm275_vm5  ;;  %v280_v10 = vsel %vm276_vm6, %v831_v11, 0.0 }
  0xa4   : > { %595 = vmatprep.subr.msk.bf16.mxu0 %vm557_vm8, %v558_v15  ;;  %599 = vmatprep.mubr.msk.bf16.mxu0 %vm557_vm8, %v558_v15  ;;  %vm560_vm9 = vmpackc.low %vm278_vm7, %vm277_vm4 }
  0xa5   : > { %603 = vmatprep.subr.msk.bf16.mxu1 %vm557_vm8, %v558_v15  ;;  %596 = vmatpush3.bf16.xpose.msk.msra.mxu0 %vm557_vm8, %v558_v15 }
  0xa6   : > { %604 = vmatpush3.bf16.msk.msra.mxu1 %vm557_vm8, %v558_v15  ;;  %597 = vmatprep.subr.msk.bf16.mxu0 %vm560_vm9, %v561_v18 }
  0xa7   : > { %605 = vmatprep.subr.msk.bf16.mxu1 %vm560_vm9, %v561_v18 }
  0xaa   : > { %606 = vmatpush3.bf16.msk.msra.mxu1 %vm560_vm9, %v561_v18 }
  0xad   : > { %598 = vmatpush3.bf16.xpose.msk.msra.mxu0 %vm560_vm9, %v561_v18 }
  0xb4   : > { %600 = vmatmul.mubr.msk.bf16.vlgmr.msra.gmra.mrb[0].mxu0 %vm560_vm9, %v561_v18 }
 0x187   : > { %v601_v20 = vpop.f32.mrb[0].mxu0 }
 0x188   : > { %v323_v22 = vpop.f32.mrb[1].mxu0  ;;  %v332_v27 = vadd.f32 %v601_v20, %v287_v21  ;;  %v279_v20 = vsel %vm275_vm5, %v833_v12, 0.0 }
 0x189   : > { %v324_v24 = vadd.f32 %v323_v22, %v285_v19  ;;  %v602_v25 = vpop.f32.mrb[2].mxu0 }
 0x18a   : > { %v326_v26 = vpop.f32.mrb[3].mxu0  ;;  %v335_v32 = vadd.f32 %v602_v25, %v288_v30  ;;  %v345_v33 = vsel %vm338_vm10, %v332_v27, -inf }
 0x18b   : > { %v327_v28 = vadd.f32 %v326_v26, %v286_v23  ;;  %v339_v29 = vsel %vm338_vm10, %v324_v24, -inf }
 0x18c   : > { %340 = vmax.xlane.f32.xlu0 %v339_v29  ;;  %v348_v34 = vsel %vm338_vm10, %v335_v32, -inf }
 0x18d   : > { %v342_v31 = vsel %vm338_vm10, %v327_v28, -inf }
 0x18e   : > { %343 = vmax.xlane.f32.xlu1 %v342_v31 }
 0x190   : > { %346 = vmax.xlane.f32.xlu0 %v345_v33 }
 0x194   : > { %349 = vmax.xlane.f32.xlu0 %v348_v34 }
 0x219   : > { %v341_v35 = vpop.xlane.xlu0 %340 }
 0x21a   : > { %v351_v36 = vsub.f32 %v324_v24, %v341_v35  ;;  %v282_v24 = vsel %vm278_vm7, %v837_v14, 0.0 }
 0x21b   : > { %v344_v37 = vpop.xlane.xlu1 %343 }
 0x21c   : > { %v355_v38 = vmul.f32 1.442695, %v351_v36  ;;  %v352_v39 = vsub.f32 %v327_v28, %v344_v37 }
 0x21d   : > { %v347_v40 = vpop.xlane.xlu0 %346 }
 0x21e   : > { %654 = vpow2.f32 %v355_v38  ;;  %v357_v41 = vmul.f32 1.442695, %v352_v39  ;;  %v353_v42 = vsub.f32 %v332_v27, %v347_v40 }
 0x220   : > { %656 = vpow2.f32 %v357_v41  ;;  %v359_v43 = vmul.f32 1.442695, %v353_v42 }
 0x221   : > { %v350_v44 = vpop.xlane.xlu0 %349 }
 0x222   : > { %658 = vpow2.f32 %v359_v43  ;;  %v354_v45 = vsub.f32 %v335_v32, %v350_v44 }
 0x224   : > { %v361_v46 = vmul.f32 1.442695, %v354_v45 }
 0x226   : > { %660 = vpow2.f32 %v361_v46 }
 0x228   : > { %v655_v47 = vpop.eup %654 }
 0x229   : > { %v363_v48 = vsel %vm338_vm10, %v655_v47, 0.0 }
 0x22a   : > { %v657_v49 = vpop.eup %656  ;;  %364 = vadd.xlane.f32.xlu1 %v363_v48 }
 0x22b   : > { %v366_v50 = vsel %vm338_vm10, %v657_v49, 0.0  ;;  %v375_v51 = vpack.c.bf16 %v657_v49, %v655_v47 }
 0x22c   : > { %v659_v52 = vpop.eup %658  ;;  %367 = vadd.xlane.f32.xlu0 %v366_v50 }
 0x22d   : > { %607 = vmatprep.mubr.msk.bf16.mxu1 %vm338_vm10, %v375_v51  ;;  %v369_v53 = vsel %vm338_vm10, %v659_v52, 0.0 }
 0x22e   : > { %370 = vadd.xlane.f32.xlu1 %v369_v53 }
 0x230   : > { %v661_v54 = vpop.eup %660 }
 0x231   : > { %v372_v55 = vsel %vm338_vm10, %v661_v54, 0.0  ;;  %v376_v56 = vpack.c.bf16 %v661_v54, %v659_v52 }
 0x232   : > { %373 = vadd.xlane.f32.xlu0 %v372_v55 }
 0x233   : > { %608 = vmatmul.mubr.msk.bf16.vlgmr.msra.gmra.mrb[0].mxu1 %vm338_vm10, %v376_v56 }
 0x2b7   : > { %v365_v57 = vpop.xlane.xlu1 %364 }
 0x2b9   : > { %v368_v58 = vpop.xlane.xlu0 %367 }
 0x2bb   : > { %v371_v59 = vpop.xlane.xlu1 %370 }
 0x2bc   : > { %662 = vrcp.f32 %v371_v59 }
 0x2bd   : > { %664 = vrcp.f32 %v365_v57 }
 0x2bf   : > { %v374_v60 = vpop.xlane.xlu0 %373 }
 0x2c0   : > { %666 = vrcp.f32 %v374_v60 }
 0x2c1   : > { %668 = vrcp.f32 %v368_v58 }
 0x2c6   : > { %v663_v61 = vpop.eup %662 }
 0x2c7   : > { %v665_v62 = vpop.eup %664  ;;  %v440_v2 = vmul.f32 %v663_v61, %v437_v63 }
 0x2c8   : > { %v438_v4 = vmul.f32 %v665_v62, %v437_v63 }
 0x2ca   : > { %v667_v0 = vpop.eup %666 }
 0x2cb   : > { %v669_v1 = vpop.eup %668  ;;  %v441_v7 = vmul.f32 %v667_v0, %v437_v63 }
 0x2cc   : > { %v439_v19 = vmul.f32 %v669_v1, %v437_v63 }
 0x306   : > { %v609_v3 = vpop.f32.mrb[0].mxu1 }
 0x307   : > { %v444_v5 = vmul.f32 %v609_v3, %v440_v2  ;;  %v417_v6 = vpop.f32.mrb[1].mxu1 }
 0x308   : > { %v442_v15 = vmul.f32 %v438_v4, %v417_v6  ;;  %v610_v18 = vpop.f32.mrb[2].mxu1  ;;  %461 = sbr.rel (!%p804_p5) target bundleno = 811 (0x32b), region = 40 }
 0x309   : > { %v448_v21 = vadd.f32 %v444_v5, %v281_v8  ;;  %v445_v22 = vmul.f32 %v610_v18, %v441_v7  ;;  %v420_v23 = vpop.f32.mrb[3].mxu1 }
 0x30a   : > { %v446_v25 = vadd.f32 %v442_v15, %v279_v20  ;;  %v443_v26 = vmul.f32 %v439_v19, %v420_v23 }
 0x30b   : > { %452 = vst [vmem:[%s220_s7 + $0x10] sm:$0xff] %v448_v21  ;;  %v449_v13 = vadd.f32 %v445_v22, %v282_v24 }
 0x30c   : > { %450 = vst [vmem:[%s220_s7] sm:$0xff] %v446_v25  ;;  %v447_v9 = vadd.f32 %v443_v26, %v280_v10 }
 0x30d   : > { %453 = vst [vmem:[%s220_s7 + $0x18] sm:$0xff] %v449_v13 }
 0x30e   : > { %451 = vst [vmem:[%s220_s7 + $0x8] sm:$0xff] %v447_v9 }
 0x30f   : > { %s970_s9 = smov (!%p464_p12, %s463_s9), 4 }
 0x310   : > { %s903_s10 = sshll.u32 %s970_s9, 7 }
 0x311   : > { %s468_s11 = ssub.s32 512, %s903_s10 }
 0x312   : > { %469 = vsyncadd %s898_s8, %s468_s11  ;;  %p580_p13 = scmp.ne.s32.totalorder %s903_s10, 0  ;;  %s586_s12 = sshll.u32 %s787_s0, 9 }
 0x313   : > { %s912_s26 = scalar_lea.hbm %s962_s4, %s586_s12  ;;  %s474_s15 = sshll.u32 %s220_s7, 4  ;;  %s914_s15 = int_to_ptr.vmem [resolvable:$true] %s474_s15 }
 0x314   : > { %s670_s28 = scalar_lea.vmem %s914_s15, %s903_s10  ;;  %s735_s16 = smov [#allocation3]  }
 0x315   : > { %p671_p0 = scmp.ne.s32.totalorder %s914_s15, %s670_s28  ;;  %s674_s21 = sshll.u32 %s735_s16, 4  ;;  %s675_s21 = int_to_ptr.vmem [resolvable:$false] %s674_s21 }
 0x316   : > { %s676_s0 = scalar_lea.vmem %s675_s21, 1024  ;;  %p677_p3 = scmp.lt.s32.totalorder %s914_s15, %s675_s21 }
 0x317   : > { %p672_p1 = pnand %p671_p0, %p580_p13  ;;  %p678_p4 = scmp.lt.s32.totalorder %s676_s0, %s670_s28 }
 0x319   : > { %p673_p2 = pneg %p672_p1  ;;  %p679_p5 = por %p678_p4, %p677_p3 }
 0x31b   : > { %p680_p7 = pnand %p679_p5, %p673_p2 }
 0x31d   : > { %683 = shalt.err (!%p680_p7)
}
 0x31e   : > { %s684_s23 = scalar_lea.hbm %s912_s26, %s903_s10  ;;  %s688_s30 = scalar_lea.hbm %s962_s4, 1280 }
 0x31f   : > { %p685_p8 = scmp.ne.s32.totalorder %s912_s26, %s684_s23  ;;  %p689_p11 = scmp.lt.u32.totalorder %s912_s26, %s962_s4 }
 0x320   : > { %p690_p12 = scmp.lt.u32.totalorder %s688_s30, %s684_s23  ;;  %p692_p1 = scmp.lt.u32.totalorder %s684_s23, %s912_s26 }
 0x321   : > { %p686_p9 = pnand %p685_p8, %p580_p13 }
 0x322   : > { %p691_p0 = por %p690_p12, %p689_p11 }
 0x323   : > { %p687_p10 = pneg %p686_p9 }
 0x324   : > { %p693_p2 = por %p692_p1, %p691_p0 }
 0x326   : > { %p694_p3 = pnand %p693_p2, %p687_p10 }
 0x328   : > { %697 = shalt.err (!%p694_p3)
}
 0x329   : > { %s736_s7 = smov 128   ;;  %s737_s9 = smov 8  }
 0x32a   : > { %480 = dma.vmem_to_hbm [thread:$0]  (%p580_p13), %s914_s15, %s903_s10, %s912_s26, %s898_s8, %s736_s7, %s736_s7, %s737_s9  }
 0x32b PF: > { %p616_p4 = scmp.ge.s32.totalorder %s732_s20, 2  ;;  %s489_s11 = sand.u32 1, %s720_s17  }
 0x32c   : > { %s490_s12 = scalar_lea.sflag [#allocation4], %s489_s11 }
 0x32d   : > { %p613_p5 = pnand %p616_p4, %p808_p6 }
 0x32f   : > { %715 = dma.done.wait (!%p613_p5), %s490_s12, 512  }
 0x330   : > { %717 = vsyncadd (!%p613_p5), %s490_s12, 4294966784  ;;  %p15_p7 = scmp.ge.s32.totalorder %s791_s22, 5   ;;  %s965_s17 = smov %s724_s18 }
 0x331   : > { %s966_s18 = smov %s728_s19  ;;  %s967_s19 = smov %s802_s25 }
 0x332   : > { %s968_s20 = smov %s791_s22  ;;  %17 = sbr.rel (!%p15_p7) target bundleno = 5 (0x5), region = 74 }
 0x339   :  { %495 = vsyncpa [#allocation4], 1 }
 0x33a   :  { %497 = vsyncpa [#allocation4 + $0x1], 1 }

</bundles_post_ra>
